<compile_context>
chip_gen: v5e
topology: v5e:2x2
jax: 0.10.0
libtpu: 0.0.40
codegen_flags: <defaults>
</compile_context>

<pallas_src>
import jax
import jax.numpy as jnp
from jax.experimental import pallas as pl


def _flatten_view_kernel(x_hbm_ref, o_hbm_ref):
    # The output buffer is aliased to the input buffer (input_output_aliases
    # below), so the flattened data is already in place.  Intentionally a
    # no-op: no DMA, no VMEM staging, no vld/vst traffic.
    del x_hbm_ref, o_hbm_ref


def _flatten_pallas(x2: jax.Array) -> jax.Array:
    batch, flat = x2.shape
    return pl.pallas_call(
        _flatten_view_kernel,
        out_shape=jax.ShapeDtypeStruct((batch, flat), x2.dtype),
        # Raw HBM refs on both sides: no auto-DMA, no tiling constraints.
        in_specs=[pl.BlockSpec(memory_space=pl.ANY)],
        out_specs=pl.BlockSpec(memory_space=pl.ANY),
        # Output 0 aliases input 0 -> the op is a view, not a copy.
        input_output_aliases={0: 0},
        # Advisory: this op is free (no flops, no bytes moved by the kernel).
        cost_estimate=pl.CostEstimate(flops=0, transcendentals=0,
                                      bytes_accessed=0),
    )(x2)


@jax.jit
def flatten(x: jax.Array) -> jax.Array:
    """Pallas equivalent of Flatten.forward."""
    if x.ndim == 0:
        # PyTorch Flatten also rejects 0-d inputs (x.size(0) raises).
        raise ValueError("Flatten requires an input with at least 1 dimension")
    if x.ndim == 1:
        x2 = x[None, :]                       # unsqueeze(dim=0)
    else:
        x2 = x.reshape(x.shape[0], -1)        # metadata-only for row-major arrays
    return _flatten_pallas(x2)


if __name__ == "__main__":
    key = jax.random.PRNGKey(0)

    # 4-D NCHW case (typical conv-feature input to Flatten).
    x = jax.random.normal(key, (2, 4, 16, 16), dtype=jnp.float32)
    y = flatten(x)
    jax.block_until_ready(y)
    assert y.shape == (2, 4 * 16 * 16)
    assert jnp.array_equal(y, x.reshape(2, -1))

    # 1-D case -> unsqueeze(0).
    k2 = jax.random.fold_in(key, 1)
    v = jax.random.normal(k2, (128,), dtype=jnp.float32)
    w = flatten(v)
    jax.block_until_ready(w)
    assert w.shape == (1, 128)
    assert jnp.array_equal(w, v[None, :])

    # Non-128-aligned flat dim (no tiling constraints remain -- nothing is tiled).
    k3 = jax.random.fold_in(key, 2)
    z = jax.random.normal(k3, (2, 3, 5, 7), dtype=jnp.float32)
    zo = flatten(z)
    jax.block_until_ready(zo)
    assert zo.shape == (2, 3 * 5 * 7)
    assert jnp.array_equal(zo, z.reshape(2, -1))

    # bf16 case (dtype-preserving view; no packing concerns since nothing moves).
    k4 = jax.random.fold_in(key, 3)
    b = jax.random.normal(k4, (2, 4, 16, 16), dtype=jnp.bfloat16)
    bo = flatten(b)
    jax.block_until_ready(bo)
    assert bo.shape == (2, 4 * 16 * 16)
    assert jnp.array_equal(bo, b.reshape(2, -1))

    print("KERNEL_OK")
</pallas_src>

<mosaic_0001>
module attributes {stable_mosaic.version = 11 : i64} {
  func.func @_flatten_view_kernel(%arg0: memref<2x1024xf32, #tpu.memory_space<any>>, %arg1: memref<2x1024xf32, #tpu.memory_space<any>>) attributes {dimension_semantics = [], scalar_prefetch = 0 : i64, scratch_operands = 0 : i64, tpu.core_type = #tpu.core_type<tc>} {
    return
  }
}

</mosaic_0001>

<bundles_post_ra>
// kernel: flatten.1
= control target key start
LH: loop header
LB: loop body
LE: loop exit
PB: predicated region body
PF: predicated region fallthrough
CT: control target
= control target key end

     0   :  { %s16_s0 = inlined_call_operand.hbm [shape: f32[2,1024], index: 0, kind: input, shape index: {}, may-alias: {0,1}]   ;;  %s17_s1 = inlined_call_operand.hbm [shape: f32[2,1024], index: 1, kind: output, shape index: {}, may-alias: {0,1}]  }

</bundles_post_ra>
